<compile_context>
chip_gen: v7x
topology: tpu7x:2x2x1
jax: 0.10.0
libtpu: 0.0.40
codegen_flags: <defaults>
</compile_context>

<pallas_src>
import jax
import jax.numpy as jnp
from jax.experimental import pallas as pl
from jax.experimental.pallas import tpu as pltpu

IN_F = 32 * 32 * 3        # 3072
HID = 100
NCLS = 10
HID_PAD = 128             # lane-padded hidden width
NCLS_PAD = 128            # lane-padded class width
NEG_BIG = jnp.float32(-1e30)   # "minus infinity" bias for padded class columns


def mlp_kernel(x_ref, w1_ref, b1_ref, w2_ref, b2_ref, o_ref):
    # x_ref:  (TB, 3072)  f32         w1_ref: (3072, 128) bf16
    # b1_ref: (1, 128)    f32         w2_ref: (128, 128)  f32
    # b2_ref: (1, 128)    f32 (cols >= 10 hold -1e30)
    # o_ref:  (TB, 128)   bf16 (softmax probs; cols >= 10 are exactly 0)

    # fc1 + ReLU: cast x to bf16 right at the MXU (x streamed from HBM as f32),
    # f32 accumulation; bias/ReLU in f32.
    x_bf16 = x_ref[...].astype(jnp.bfloat16)
    h = jnp.dot(x_bf16, w1_ref[...], preferred_element_type=jnp.float32)
    h = jnp.maximum(h + b1_ref[...], 0.0)

    # fc2 entirely in f32 (tiny matmul: <5% of FLOPs) — no second bf16
    # quantization of the activations.  Padded hidden cols of h are 0 and
    # padded W2 rows are 0, so padding is inert; padded class columns carry
    # bias -1e30 so their exp() underflows to exactly 0 below.
    logits = jnp.dot(h, w2_ref[...], preferred_element_type=jnp.float32) + b2_ref[...]

    # numerically stable softmax along dim=1 (f32); divide via EUP reciprocal.
    m = jnp.max(logits, axis=-1, keepdims=True)
    e = jnp.exp(logits - m)
    s = jnp.sum(e, axis=-1, keepdims=True)
    o_ref[...] = (e * pl.reciprocal(s, approx=True)).astype(o_ref.dtype)


def prepare_params(w1, b1, w2, b2):
    """One-time parameter prep (pad to lane width 128, cast).  Hoisted out of
    the forward pass so the ~2-3 MB pad/cast is off the per-call critical path."""
    w1_p = jnp.zeros((IN_F, HID_PAD), jnp.bfloat16).at[:, :HID].set(w1.astype(jnp.bfloat16))
    b1_p = jnp.zeros((1, HID_PAD), jnp.float32).at[0, :HID].set(b1.astype(jnp.float32))
    w2_p = jnp.zeros((HID_PAD, NCLS_PAD), jnp.float32).at[:HID, :NCLS].set(w2.astype(jnp.float32))
    b2_p = jnp.full((1, NCLS_PAD), NEG_BIG, jnp.float32).at[0, :NCLS].set(b2.astype(jnp.float32))
    return w1_p, b1_p, w2_p, b2_p


def _choose_tb(b_eff, tb_max):
    """Batch tile: big enough to amortize ~0.35us/step overhead, small enough to
    fit v7x's 64 MiB/TC VMEM, and giving >=2 (ideally 4+) grid steps for large
    batches so the 2 v7x TensorCores both stream HBM."""
    b8 = max(8, pl.cdiv(b_eff, 8) * 8)
    if b8 <= 256:
        return b8                          # single small tile
    tb = max(256, pl.cdiv(b8, 4))          # aim for >=4 grid steps
    tb = pl.cdiv(tb, 256) * 256            # multiple of 256 fills the MXU M dim
    return min(tb, tb_max)


def mlp_forward(x_nchw, params, *, tb_max=512):
    """x_nchw: (B, 3, 32, 32) float32 -> (B, 10) softmax probabilities (f32)."""
    w1_p, b1_p, w2_p, b2_p = params
    B = x_nchw.shape[0]
    # Same C-order flatten as torch's x.view(-1, 3072); free (no dtype change).
    x = x_nchw.reshape(B, IN_F)

    # Only pad tiny batches up to one sublane (8 rows).  For B >= 8 the partial
    # last block is handled by Pallas: out-of-bounds reads give garbage rows,
    # their writes are dropped, and the [:B] slice below discards them.
    B_eff = max(B, 8)
    if B_eff != B:
        x = jnp.zeros((B_eff, IN_F), x.dtype).at[:B].set(x)

    TB = _choose_tb(B_eff, tb_max)
    grid = (pl.cdiv(B_eff, TB),)

    out = pl.pallas_call(
        mlp_kernel,
        out_shape=jax.ShapeDtypeStruct((B_eff, NCLS_PAD), jnp.bfloat16),
        grid=grid,
        in_specs=[
            pl.BlockSpec((TB, IN_F), lambda i: (i, 0)),          # x: streamed f32 per step
            pl.BlockSpec((IN_F, HID_PAD), lambda i: (0, 0)),     # W1: VMEM-resident (DMA'd once)
            pl.BlockSpec((1, HID_PAD), lambda i: (0, 0)),        # b1: resident
            pl.BlockSpec((HID_PAD, NCLS_PAD), lambda i: (0, 0)), # W2: resident (f32)
            pl.BlockSpec((1, NCLS_PAD), lambda i: (0, 0)),       # b2: resident
        ],
        out_specs=pl.BlockSpec((TB, NCLS_PAD), lambda i: (i, 0)),  # lane-dense bf16 output
        compiler_params=pltpu.CompilerParams(
            dimension_semantics=("parallel",),   # shard batch steps across TCs (v7x)
            vmem_limit_bytes=32 << 20,           # footprint @ TB=512 ~ 18 MiB
        ),
    )(x, w1_p, b1_p, w2_p, b2_p)

    return out[:B, :NCLS].astype(jnp.float32)


def init_params(key):
    """Deterministic init mimicking nn.Linear default (uniform in +/- 1/sqrt(fan_in))."""
    k1, k2, k3, k4 = jax.random.split(key, 4)
    bound1 = 1.0 / jnp.sqrt(IN_F)
    bound2 = 1.0 / jnp.sqrt(HID)
    w1 = jax.random.uniform(k1, (IN_F, HID), jnp.float32, -bound1, bound1)
    b1 = jax.random.uniform(k2, (HID,), jnp.float32, -bound1, bound1)
    w2 = jax.random.uniform(k3, (HID, NCLS), jnp.float32, -bound2, bound2)
    b2 = jax.random.uniform(k4, (NCLS,), jnp.float32, -bound2, bound2)
    return w1, b1, w2, b2


def mlp_reference(x_nchw, w1, b1, w2, b2):
    """Pure-JAX f32 reference matching the PyTorch module."""
    x = x_nchw.reshape(x_nchw.shape[0], IN_F)
    h = jnp.maximum(x @ w1 + b1, 0.0)
    logits = h @ w2 + b2
    return jax.nn.softmax(logits, axis=1)


if __name__ == "__main__":
    key = jax.random.PRNGKey(0)
    k_x, k_p = jax.random.split(key)

    # Small deterministic input consistent with the module: B=2, NCHW (2, 3, 32, 32)
    x = jax.random.normal(k_x, (2, 3, 32, 32), jnp.float32)
    w1, b1, w2, b2 = init_params(k_p)

    params = prepare_params(w1, b1, w2, b2)   # one-time param prep (off critical path)
    out = mlp_forward(x, params)
    out = jax.block_until_ready(out)

    # sanity: shape, softmax rows ~sum to 1 (bf16 output + approx reciprocal),
    # and match the f32 reference.
    assert out.shape == (2, NCLS)
    assert jnp.allclose(jnp.sum(out, axis=1), 1.0, atol=2e-2)
    ref = mlp_reference(x, w1, b1, w2, b2)
    assert jnp.allclose(out, ref, atol=2e-2), float(jnp.max(jnp.abs(out - ref)))

    print("KERNEL_OK")
</pallas_src>

<mosaic_0001>
module attributes {stable_mosaic.version = 11 : i64} {
  func.func @mlp_kernel(%arg0: i32, %arg1: memref<8x3072xf32, #tpu.memory_space<vmem>>, %arg2: memref<3072x128xbf16, #tpu.memory_space<vmem>>, %arg3: memref<1x128xf32, #tpu.memory_space<vmem>>, %arg4: memref<128x128xf32, #tpu.memory_space<vmem>>, %arg5: memref<1x128xf32, #tpu.memory_space<vmem>>, %arg6: memref<8x128xbf16, #tpu.memory_space<vmem>>) attributes {dimension_semantics = [#tpu.dimension_semantics<parallel>], iteration_bounds = array<i64: 1>, scalar_prefetch = 0 : i64, scratch_operands = 0 : i64, tpu.core_type = #tpu.core_type<tc>, window_params = [{transform_indices = @transform_0, window_bounds = array<i64: 8, 3072>}, {pipeline_mode = #tpu.pipeline_mode<synchronous>, transform_indices = @transform_1, window_bounds = array<i64: 3072, 128>}, {pipeline_mode = #tpu.pipeline_mode<synchronous>, transform_indices = @transform_2, window_bounds = array<i64: 1, 128>}, {pipeline_mode = #tpu.pipeline_mode<synchronous>, transform_indices = @transform_3, window_bounds = array<i64: 128, 128>}, {pipeline_mode = #tpu.pipeline_mode<synchronous>, transform_indices = @transform_4, window_bounds = array<i64: 1, 128>}, {transform_indices = @transform_5, window_bounds = array<i64: 8, 128>}]} {
    %c0 = arith.constant 0 : index
    %c0_0 = arith.constant 0 : index
    %0 = vector.load %arg1[%c0, %c0_0] : memref<8x3072xf32, #tpu.memory_space<vmem>>, vector<8x3072xf32>
    %1 = arith.truncf %0 : vector<8x3072xf32> to vector<8x3072xbf16>
    %c0_1 = arith.constant 0 : index
    %c0_2 = arith.constant 0 : index
    %2 = vector.load %arg2[%c0_1, %c0_2] : memref<3072x128xbf16, #tpu.memory_space<vmem>>, vector<3072x128xbf16>
    %cst = arith.constant dense<0.000000e+00> : vector<8x128xf32>
    %3 = tpu.matmul %1, %2, %cst {dimension_numbers = #tpu.dot_dimension_numbers<[1], [0], [0], [1], [0, 0, 1, 1], [], []>} : vector<8x3072xbf16>, vector<3072x128xbf16>, vector<8x128xf32> -> vector<8x128xf32>
    %c0_3 = arith.constant 0 : index
    %c0_4 = arith.constant 0 : index
    %4 = vector.load %arg3[%c0_3, %c0_4] : memref<1x128xf32, #tpu.memory_space<vmem>>, vector<1x128xf32>
    %5 = vector.broadcast %4 : vector<1x128xf32> to vector<8x128xf32>
    %6 = arith.addf %3, %5 : vector<8x128xf32>
    %cst_5 = arith.constant 0.000000e+00 : f32
    %7 = vector.broadcast %cst_5 : f32 to vector<8x128xf32>
    %8 = arith.maximumf %6, %7 : vector<8x128xf32>
    %c0_6 = arith.constant 0 : index
    %c0_7 = arith.constant 0 : index
    %9 = vector.load %arg4[%c0_6, %c0_7] : memref<128x128xf32, #tpu.memory_space<vmem>>, vector<128x128xf32>
    %cst_8 = arith.constant dense<0.000000e+00> : vector<8x128xf32>
    %10 = tpu.matmul %8, %9, %cst_8 {dimension_numbers = #tpu.dot_dimension_numbers<[1], [0], [0], [1], [0, 0, 1, 1], [], []>} : vector<8x128xf32>, vector<128x128xf32>, vector<8x128xf32> -> vector<8x128xf32>
    %c0_9 = arith.constant 0 : index
    %c0_10 = arith.constant 0 : index
    %11 = vector.load %arg5[%c0_9, %c0_10] : memref<1x128xf32, #tpu.memory_space<vmem>>, vector<1x128xf32>
    %12 = vector.broadcast %11 : vector<1x128xf32> to vector<8x128xf32>
    %13 = arith.addf %10, %12 : vector<8x128xf32>
    %cst_11 = arith.constant dense<0xFF800000> : vector<8xf32>
    %14 = vector.multi_reduction <maximumf>, %13, %cst_11 [1] : vector<8x128xf32> to vector<8xf32>
    %15 = vector.shape_cast %14 : vector<8xf32> to vector<8x1xf32>
    %16 = vector.broadcast %15 : vector<8x1xf32> to vector<8x128xf32>
    %17 = arith.subf %13, %16 : vector<8x128xf32>
    %18 = math.exp %17 : vector<8x128xf32>
    %cst_12 = arith.constant dense<0.000000e+00> : vector<8xf32>
    %19 = vector.multi_reduction <add>, %18, %cst_12 [1] : vector<8x128xf32> to vector<8xf32>
    %20 = vector.shape_cast %19 : vector<8xf32> to vector<8x1xf32>
    %21 = tpu.reciprocal %20 {approx = true} : vector<8x1xf32> -> vector<8x1xf32>
    %22 = vector.broadcast %21 : vector<8x1xf32> to vector<8x128xf32>
    %23 = arith.mulf %18, %22 : vector<8x128xf32>
    %24 = arith.truncf %23 : vector<8x128xf32> to vector<8x128xbf16>
    %c0_13 = arith.constant 0 : index
    %c0_14 = arith.constant 0 : index
    %25 = vector.load %arg6[%c0_13, %c0_14] : memref<8x128xbf16, #tpu.memory_space<vmem>>, vector<8x128xbf16>
    tpu.vector_store %arg6[%c0_13, %c0_14], %24 {strides = array<i32>} : memref<8x128xbf16, #tpu.memory_space<vmem>>, vector<8x128xbf16>,
    return
  }
  func.func @transform_0(%arg0: i32) -> (i32, i32) {
    %c0_i32 = arith.constant 0 : i32
    %c0_i32_0 = arith.constant 0 : i32
    return %arg0, %c0_i32 : i32, i32
  }
  func.func @transform_1(%arg0: i32) -> (i32, i32) {
    %c0_i32 = arith.constant 0 : i32
    %c0_i32_0 = arith.constant 0 : i32
    %c0_i32_1 = arith.constant 0 : i32
    return %c0_i32, %c0_i32_0 : i32, i32
  }
  func.func @transform_2(%arg0: i32) -> (i32, i32) {
    %c0_i32 = arith.constant 0 : i32
    %c0_i32_0 = arith.constant 0 : i32
    %c0_i32_1 = arith.constant 0 : i32
    return %c0_i32, %c0_i32_0 : i32, i32
  }
  func.func @transform_3(%arg0: i32) -> (i32, i32) {
    %c0_i32 = arith.constant 0 : i32
    %c0_i32_0 = arith.constant 0 : i32
    %c0_i32_1 = arith.constant 0 : i32
    return %c0_i32, %c0_i32_0 : i32, i32
  }
  func.func @transform_4(%arg0: i32) -> (i32, i32) {
    %c0_i32 = arith.constant 0 : i32
    %c0_i32_0 = arith.constant 0 : i32
    %c0_i32_1 = arith.constant 0 : i32
    return %c0_i32, %c0_i32_0 : i32, i32
  }
  func.func @transform_5(%arg0: i32) -> (i32, i32) {
    %c0_i32 = arith.constant 0 : i32
    %c0_i32_0 = arith.constant 0 : i32
    return %arg0, %c0_i32 : i32, i32
  }
}

</mosaic_0001>

<bundles_post_ra>
// kernel: tpu_custom_call.1
= control target key start
LH: loop header
LB: loop body
LE: loop exit
PB: predicated region body
PF: predicated region fallthrough
CT: control target
= control target key end

     0   :  { %10 = vsyncpa [#allocation3], 0  ;;  %s3183_s0 = inlined_call_operand.hbm [shape: f32[8,3072], index: 0, kind: input, shape index: {}]   ;;  %s3184_s1 = inlined_call_operand.hbm [shape: bf16[3072,128], index: 1, kind: input, shape index: {}]   ;;  %s3185_s2 = inlined_call_operand.vmem [shape: f32[1,128], index: 2, kind: input, shape index: {}]   ;;  %s3186_s3 = inlined_call_operand.hbm [shape: f32[128,128], index: 3, kind: input, shape index: {}]   ;;  %s3187_s4 = inlined_call_operand.vmem [shape: f32[1,128], index: 4, kind: input, shape index: {}]   ;;  %s3188_s5 = inlined_call_operand.hbm [shape: bf16[8,128], index: 5, kind: output, shape index: {}]  }
   0x1   :  { %11 = vsyncpa [#allocation6], 0 }
   0x2   :  { %12 = vsyncpa [#allocation4], 0  ;;  %s3088_s18 = smov [#allocation5]   ;;  %s2994_s22 = scalar_lea.hbm %s3184_s1, 24576 }
   0x3   :  { %s28_s19 = sshll.u32 %s3088_s18, 4  ;;  %p2995_p0 = scmp.ne.s32.totalorder %s3184_s1, %s2994_s22  ;;  %s29_s19 = int_to_ptr.vmem [resolvable:$true] %s28_s19 }
   0x4   :  { %p2998_p1 = scmp.lt.u32.totalorder %s2994_s22, %s3184_s1 }
   0x6   :  { %p3000_p2 = pnand %p2998_p1, %p2995_p0 }
   0x8   :  { %3003 = shalt.err (!%p3000_p2)
}
   0x9   :  { %s3004_s27 = scalar_lea.vmem %s29_s19, 24576  ;;  %p3009_p4 = scmp.lt.s32.totalorder %s29_s19, %s29_s19 }
   0xa   :  { %p3005_p3 = scmp.ne.s32.totalorder %s29_s19, %s3004_s27  ;;  %p3010_p5 = scmp.lt.s32.totalorder %s3004_s27, %s3004_s27 }
   0xc   :  { %p3011_p6 = por %p3010_p5, %p3009_p4 }
   0xe   :  { %p3012_p7 = pnand %p3011_p6, %p3005_p3 }
  0x10   :  { %3015 = shalt.err (!%p3012_p7)
}
  0x11   :  { %s3089_s28 = smov 64   ;;  %s3090_s29 = smov 4  }
  0x12   :  { %34 = dma.hbm_to_vmem [thread:$0]  %s3184_s1, 24576, %s29_s19, [#allocation6], %s3089_s28, %s3089_s28, %s3090_s29  }
  0x13   :  { %s3091_s7 = smov [#allocation2]   ;;  %s3092_s9 = smov [#allocation7]  }
  0x14   :  { %s19_s8 = sshll.u32 %s3091_s7, 4  ;;  %s42_s10 = sshll.u32 %s3092_s9, 4  ;;  %s20_s8 = int_to_ptr.vmem [resolvable:$true] %s19_s8  ;;  %s43_s10 = int_to_ptr.vmem [resolvable:$true] %s42_s10 }
  0x15   :  { %s3016_s13 = scalar_lea.hbm %s3183_s0, 3072 }
  0x16   :  { %p3017_p8 = scmp.ne.s32.totalorder %s3183_s0, %s3016_s13  ;;  %p3020_p9 = scmp.lt.u32.totalorder %s3016_s13, %s3183_s0 }
  0x18   :  { %p3022_p10 = pnand %p3020_p9, %p3017_p8 }
  0x1a   :  { %3025 = shalt.err (!%p3022_p10)
}
  0x1b   :  { %s3026_s1 = scalar_lea.vmem %s20_s8, 3072  ;;  %p3031_p12 = scmp.lt.s32.totalorder %s20_s8, %s20_s8 }
  0x1c   :  { %p3027_p11 = scmp.ne.s32.totalorder %s20_s8, %s3026_s1  ;;  %p3032_p13 = scmp.lt.s32.totalorder %s3026_s1, %s3026_s1 }
  0x1e   :  { %p3033_p0 = por %p3032_p13, %p3031_p12 }
  0x20   :  { %p3034_p1 = pnand %p3033_p0, %p3027_p11 }
  0x22   :  { %3037 = shalt.err (!%p3034_p1)
}
  0x23   :  { %22 = dma.hbm_to_vmem [thread:$0]  %s3183_s0, 3072, %s20_s8, [#allocation3]  }
  0x24   :  { %s3038_s22 = scalar_lea.hbm %s3186_s3, 2048 }
  0x25   :  { %p3039_p2 = scmp.ne.s32.totalorder %s3186_s3, %s3038_s22  ;;  %p3042_p3 = scmp.lt.u32.totalorder %s3038_s22, %s3186_s3 }
  0x27   :  { %p3044_p4 = pnand %p3042_p3, %p3039_p2 }
  0x29   :  { %3047 = shalt.err (!%p3044_p4)
}
  0x2a   :  { %s3048_s27 = scalar_lea.vmem %s43_s10, 2048  ;;  %p3053_p6 = scmp.lt.s32.totalorder %s43_s10, %s43_s10 }
  0x2b   :  { %p3049_p5 = scmp.ne.s32.totalorder %s43_s10, %s3048_s27  ;;  %p3054_p7 = scmp.lt.s32.totalorder %s3048_s27, %s3048_s27 }
  0x2d   :  { %p3055_p8 = por %p3054_p7, %p3053_p6 }
  0x2f   :  { %p3056_p9 = pnand %p3055_p8, %p3049_p5 }
  0x31   :  { %3059 = shalt.err (!%p3056_p9)
}
  0x32   :  { %s3093_s0 = smov 128   ;;  %s3094_s28 = smov 8  }
  0x33   :  { %48 = dma.hbm_to_vmem [thread:$0]  %s3186_s3, 2048, %s43_s10, [#allocation6], %s3093_s0, %s3093_s0, %s3094_s28  }
  0x34   :  { %3082 = dma.done.wait [#allocation3], 3072  }
  0x35   :  { %3083 = vsyncadd [#allocation3], 4294964224 }
  0x36   :  { %3084 = dma.done.wait [#allocation6], 26624  }
  0x37   :  { %3085 = vsyncadd [#allocation6], 4294940672  ;;  %v2798_v0 = vld [vmem:[#allocation5 + $0x40] sm:$0xff]   ;;  %v2802_v4 = vld [vmem:[#allocation5 + $0x48] sm:$0xff]   ;;  %vm3096_vm0 = vmmov 0   ;;  %s3098_s8 = smov [#allocation8]  }
  0x38   :  { %v2799_v1 = vld [vmem:[#allocation5 + $0xc0] sm:$0xff]   ;;  %2447 = vmatprep.subr.bf16.mxu0 %v2798_v0  ;;  %v2803_v5 = vld [vmem:[#allocation5 + $0xc8] sm:$0xff]   ;;  %v2806_v8 = vld [vmem:[#allocation5 + $0x50] sm:$0xff]   ;;  %s2243_s9 = sshll.u32 %s3098_s8, 4  ;;  %s2244_s9 = int_to_ptr.vmem [resolvable:$true] %s2243_s9 }
  0x39   :  { %v2800_v2 = vld [vmem:[#allocation5] sm:$0xff]   ;;  %2469 = vmatprep.subr.bf16.mxu1 %v2799_v1  ;;  %v2804_v6 = vld [vmem:[#allocation5 + $0x8] sm:$0xff]   ;;  %v2807_v9 = vld [vmem:[#allocation5 + $0xd0] sm:$0xff]   ;;  %p3065_p11 = scmp.lt.s32.totalorder %s2244_s9, %s2244_s9 }
  0x3a   :  { %v2801_v3 = vld [vmem:[#allocation5 + $0x80] sm:$0xff]   ;;  %2448 = vmatpush3.bf16.msra.mxu0 %v2800_v2  ;;  %v2805_v7 = vld [vmem:[#allocation5 + $0x88] sm:$0xff]   ;;  %v2808_v10 = vld [vmem:[#allocation5 + $0x10] sm:$0xff]  }
  0x3b   :  { %2470 = vmatpush3.bf16.msra.mxu1 %v2801_v3  ;;  %2449 = vmatprep.subr.bf16.mxu0 %v2802_v4  ;;  %v2809_v11 = vld [vmem:[#allocation5 + $0x90] sm:$0xff]   ;;  %v2810_v12 = vld [vmem:[#allocation5 + $0x58] sm:$0xff]   ;;  %v2814_v16 = vld [vmem:[#allocation5 + $0x60] sm:$0xff]  }
  0x3c   :  { %2471 = vmatprep.subr.bf16.mxu1 %v2803_v5  ;;  %v2811_v13 = vld [vmem:[#allocation5 + $0xd8] sm:$0xff]   ;;  %v2815_v17 = vld [vmem:[#allocation5 + $0xe0] sm:$0xff]   ;;  %v2818_v20 = vld [vmem:[#allocation5 + $0x68] sm:$0xff]  }
  0x3d   :  { %v2812_v14 = vld [vmem:[#allocation5 + $0x18] sm:$0xff]   ;;  %v2816_v18 = vld [vmem:[#allocation5 + $0x20] sm:$0xff]   ;;  %v2819_v21 = vld [vmem:[#allocation5 + $0xe8] sm:$0xff]  }
  0x3e   :  { %2450 = vmatpush3.bf16.msra.mxu0 %v2804_v6  ;;  %v2813_v15 = vld [vmem:[#allocation5 + $0x98] sm:$0xff]   ;;  %v2817_v19 = vld [vmem:[#allocation5 + $0xa0] sm:$0xff]   ;;  %v2820_v22 = vld [vmem:[#allocation5 + $0x28] sm:$0xff]  }
  0x3f   :  { %2472 = vmatpush3.bf16.msra.mxu1 %v2805_v7  ;;  %2451 = vmatprep.subr.bf16.mxu0 %v2806_v8  ;;  %v2821_v23 = vld [vmem:[#allocation5 + $0xa8] sm:$0xff]   ;;  %v2822_v24 = vld [vmem:[#allocation5 + $0x70] sm:$0xff]   ;;  %v2826_v28 = vld [vmem:[#allocation5 + $0x78] sm:$0xff]  }
  0x40   :  { %2473 = vmatprep.subr.bf16.mxu1 %v2807_v9  ;;  %v2823_v25 = vld [vmem:[#allocation5 + $0xf0] sm:$0xff]   ;;  %v2827_v29 = vld [vmem:[#allocation5 + $0xf8] sm:$0xff]   ;;  %v62_v32 = vld [vmem:[#allocation2 + $0x8] sm:$0xff] }
  0x41   :  { %v2824_v26 = vld [vmem:[#allocation5 + $0x30] sm:$0xff]   ;;  %v2828_v30 = vld [vmem:[#allocation5 + $0x38] sm:$0xff]   ;;  %v61_v34 = vld [vmem:[#allocation2] sm:$0xff]  ;;  %v86_v35 = vpack.c.bf16 %v62_v32, %v62_v32 }
  0x42   :  { %2452 = vmatpush3.bf16.msra.mxu0 %v2808_v10  ;;  %v2825_v27 = vld [vmem:[#allocation5 + $0xb0] sm:$0xff]   ;;  %v2829_v31 = vld [vmem:[#allocation5 + $0xb8] sm:$0xff]   ;;  %v85_v37 = vpack.c.bf16 %v61_v34, %v61_v34  ;;  %v2830_v40 = vld [vmem:[#allocation5 + $0x140] sm:$0xff]  }
  0x43   :  { %2474 = vmatpush3.bf16.msra.mxu1 %v2809_v11  ;;  %2453 = vmatprep.subr.bf16.mxu0 %v2810_v12  ;;  %v64_v33 = vld [vmem:[#allocation2 + $0x18] sm:$0xff]  ;;  %v63_v38 = vld [vmem:[#allocation2 + $0x10] sm:$0xff]  ;;  %v2831_v41 = vld [vmem:[#allocation5 + $0x1c0] sm:$0xff]  }
  0x44   :  { %2475 = vmatprep.subr.bf16.mxu1 %v2811_v13  ;;  %v88_v36 = vpack.c.bf16 %v64_v33, %v64_v33  ;;  %v87_v39 = vpack.c.bf16 %v63_v38, %v63_v38  ;;  %1684 = vmatprep.mubr.bf16.mxu0 %v86_v35  ;;  %v2832_v42 = vld [vmem:[#allocation5 + $0x100] sm:$0xff]   ;;  %v2834_v44 = vld [vmem:[#allocation5 + $0x148] sm:$0xff]   ;;  %v2838_v48 = vld [vmem:[#allocation5 + $0x150] sm:$0xff]  }
  0x45   :  { %v2833_v43 = vld [vmem:[#allocation5 + $0x180] sm:$0xff]   ;;  %v2835_v45 = vld [vmem:[#allocation5 + $0x1c8] sm:$0xff]   ;;  %v2839_v49 = vld [vmem:[#allocation5 + $0x1d0] sm:$0xff]  }
  0x46   :  { %2454 = vmatpush3.bf16.msra.mxu0 %v2812_v14  ;;  %1724 = vmatprep.mubr.bf16.mxu1 %v88_v36  ;;  %v2836_v46 = vld [vmem:[#allocation5 + $0x108] sm:$0xff]   ;;  %v2840_v50 = vld [vmem:[#allocation5 + $0x110] sm:$0xff]   ;;  %v2842_v52 = vld [vmem:[#allocation5 + $0x158] sm:$0xff]  }
  0x47   :  { %2476 = vmatpush3.bf16.msra.mxu1 %v2813_v15  ;;  %2455 = vmatprep.subr.bf16.mxu0 %v2814_v16  ;;  %v2837_v47 = vld [vmem:[#allocation5 + $0x188] sm:$0xff]   ;;  %v2841_v51 = vld [vmem:[#allocation5 + $0x190] sm:$0xff]   ;;  %v2843_v53 = vld [vmem:[#allocation5 + $0x1d8] sm:$0xff]  }
  0x48   :  { %2477 = vmatprep.subr.bf16.mxu1 %v2815_v17  ;;  %v2844_v54 = vld [vmem:[#allocation5 + $0x118] sm:$0xff]   ;;  %v2846_v56 = vld [vmem:[#allocation5 + $0x160] sm:$0xff]   ;;  %v2850_v60 = vld [vmem:[#allocation5 + $0x168] sm:$0xff]  }
  0x49   :  { %v2845_v55 = vld [vmem:[#allocation5 + $0x198] sm:$0xff]   ;;  %v2847_v57 = vld [vmem:[#allocation5 + $0x1e0] sm:$0xff]   ;;  %v2851_v61 = vld [vmem:[#allocation5 + $0x1e8] sm:$0xff]  }
  0x4a   :  { %2456 = vmatpush3.bf16.msra.mxu0 %v2816_v18  ;;  %v2848_v58 = vld [vmem:[#allocation5 + $0x120] sm:$0xff]   ;;  %v2852_v62 = vld [vmem:[#allocation5 + $0x128] sm:$0xff]   ;;  %v2854_v0 = vld [vmem:[#allocation5 + $0x170] sm:$0xff]  }
  0x4b   :  { %2478 = vmatpush3.bf16.msra.mxu1 %v2817_v19  ;;  %2457 = vmatprep.subr.bf16.mxu0 %v2818_v20  ;;  %v2849_v59 = vld [vmem:[#allocation5 + $0x1a0] sm:$0xff]   ;;  %v2853_v63 = vld [vmem:[#allocation5 + $0x1a8] sm:$0xff]   ;;  %v2855_v1 = vld [vmem:[#allocation5 + $0x1f0] sm:$0xff]  }
  0x4c   :  { %2479 = vmatprep.subr.bf16.mxu1 %v2819_v21  ;;  %v2856_v2 = vld [vmem:[#allocation5 + $0x130] sm:$0xff]   ;;  %v2858_v4 = vld [vmem:[#allocation5 + $0x178] sm:$0xff]   ;;  %v66_v8 = vld [vmem:[#allocation2 + $0x28] sm:$0xff] }
  0x4d   :  { %v2857_v3 = vld [vmem:[#allocation5 + $0x1b0] sm:$0xff]   ;;  %v2859_v5 = vld [vmem:[#allocation5 + $0x1f8] sm:$0xff]   ;;  %v90_v10 = vpack.c.bf16 %v66_v8, %v66_v8  ;;  %v65_v12 = vld [vmem:[#allocation2 + $0x20] sm:$0xff] }
  0x4e   :  { %2458 = vmatpush3.bf16.msra.mxu0 %v2820_v22  ;;  %v2860_v6 = vld [vmem:[#allocation5 + $0x138] sm:$0xff]   ;;  %v67_v13 = vld [vmem:[#allocation2 + $0x30] sm:$0xff]  ;;  %v89_v14 = vpack.c.bf16 %v65_v12, %v65_v12  ;;  %v2862_v16 = vld [vmem:[#allocation5 + $0x240] sm:$0xff]  }
  0x4f   :  { %2480 = vmatpush3.bf16.msra.mxu1 %v2821_v23  ;;  %2459 = vmatprep.subr.bf16.mxu0 %v2822_v24  ;;  %v2861_v7 = vld [vmem:[#allocation5 + $0x1b8] sm:$0xff]   ;;  %v91_v15 = vpack.c.bf16 %v67_v13, %v67_v13  ;;  %v2863_v17 = vld [vmem:[#allocation5 + $0x2c0] sm:$0xff]   ;;  %v2866_v20 = vld [vmem:[#allocation5 + $0x248] sm:$0xff]  }
  0x50   :  { %2481 = vmatprep.subr.bf16.mxu1 %v2823_v25  ;;  %v68_v9 = vld [vmem:[#allocation2 + $0x38] sm:$0xff]  ;;  %v2864_v18 = vld [vmem:[#allocation5 + $0x200] sm:$0xff]   ;;  %v2867_v21 = vld [vmem:[#allocation5 + $0x2c8] sm:$0xff]  }
  0x51   :  { %v92_v11 = vpack.c.bf16 %v68_v9, %v68_v9  ;;  %v2865_v19 = vld [vmem:[#allocation5 + $0x280] sm:$0xff]   ;;  %v2868_v22 = vld [vmem:[#allocation5 + $0x208] sm:$0xff]   ;;  %v2870_v24 = vld [vmem:[#allocation5 + $0x250] sm:$0xff]  }
  0x52   :  { %2460 = vmatpush3.bf16.msra.mxu0 %v2824_v26  ;;  %v2869_v23 = vld [vmem:[#allocation5 + $0x288] sm:$0xff]   ;;  %v2871_v25 = vld [vmem:[#allocation5 + $0x2d0] sm:$0xff]   ;;  %v2878_v32 = vld [vmem:[#allocation5 + $0x260] sm:$0xff]  }
  0x53   :  { %2482 = vmatpush3.bf16.msra.mxu1 %v2825_v27  ;;  %2461 = vmatprep.subr.bf16.mxu0 %v2826_v28  ;;  %v2872_v26 = vld [vmem:[#allocation5 + $0x210] sm:$0xff]   ;;  %v2874_v28 = vld [vmem:[#allocation5 + $0x258] sm:$0xff]   ;;  %v2879_v33 = vld [vmem:[#allocation5 + $0x2e0] sm:$0xff]  }
  0x54   :  { %2483 = vmatprep.subr.bf16.mxu1 %v2827_v29  ;;  %v2873_v27 = vld [vmem:[#allocation5 + $0x290] sm:$0xff]   ;;  %v2875_v29 = vld [vmem:[#allocation5 + $0x2d8] sm:$0xff]   ;;  %v2880_v34 = vld [vmem:[#allocation5 + $0x220] sm:$0xff]  }
  0x55   :  { %v2881_v35 = vld [vmem:[#allocation5 + $0x2a0] sm:$0xff]   ;;  %v2882_v36 = vld [vmem:[#allocation5 + $0x268] sm:$0xff]  }
  0x56   :  { %2462 = vmatpush3.bf16.msra.mxu0 %v2828_v30  ;;  %v2876_v30 = vld [vmem:[#allocation5 + $0x218] sm:$0xff]   ;;  %v2884_v38 = vld [vmem:[#allocation5 + $0x228] sm:$0xff]   ;;  %v2910_v8 = vld [vmem:[#allocation5 + $0x360] sm:$0xff]  }
  0x57   :  { %2484 = vmatpush3.bf16.msra.mxu1 %v2829_v31  ;;  %2491 = vmatprep.subr.bf16.mxu0 %v2830_v40  ;;  %v2877_v31 = vld [vmem:[#allocation5 + $0x298] sm:$0xff]   ;;  %v2886_v40 = vld [vmem:[#allocation5 + $0x270] sm:$0xff]   ;;  %v2911_v9 = vld [vmem:[#allocation5 + $0x3e0] sm:$0xff]  }
  0x58   :  { %2513 = vmatprep.subr.bf16.mxu1 %v2831_v41  ;;  %v2887_v41 = vld [vmem:[#allocation5 + $0x2f0] sm:$0xff]   ;;  %v2914_v12 = vld [vmem:[#allocation5 + $0x368] sm:$0xff]  }
  0x59   :  { %1685 = vmatmul.mubr.bf16.vlgmr.msra.gmra.mrb[0].mxu0 %v85_v37  ;;  %v2883_v37 = vld [vmem:[#allocation5 + $0x2e8] sm:$0xff]  }
  0x5a   :  { %1725 = vmatmul.mubr.bf16.vlgmr.msra.gmra.mrb[0].mxu1 %v87_v39  ;;  %2492 = vmatpush3.bf16.msra.mxu0 %v2832_v42  ;;  %v2885_v39 = vld [vmem:[#allocation5 + $0x2a8] sm:$0xff]   ;;  %v2888_v42 = vld [vmem:[#allocation5 + $0x230] sm:$0xff]  }
  0x5b   :  { %2514 = vmatpush3.bf16.msra.mxu1 %v2833_v43  ;;  %2493 = vmatprep.subr.bf16.mxu0 %v2834_v44  ;;  %v2889_v43 = vld [vmem:[#allocation5 + $0x2b0] sm:$0xff]   ;;  %v2890_v44 = vld [vmem:[#allocation5 + $0x278] sm:$0xff]   ;;  %v2915_v13 = vld [vmem:[#allocation5 + $0x3e8] sm:$0xff]  }
  0x5c   :  { %2515 = vmatprep.subr.bf16.mxu1 %v2835_v45  ;;  %1764 = vmatprep.mubr.bf16.mxu0 %v90_v10  ;;  %v2891_v45 = vld [vmem:[#allocation5 + $0x2f8] sm:$0xff]   ;;  %v2912_v10 = vld [vmem:[#allocation5 + $0x320] sm:$0xff]  }
  0x5d   :  { %1804 = vmatprep.mubr.bf16.mxu1 %v92_v11  ;;  %v2913_v11 = vld [vmem:[#allocation5 + $0x3a0] sm:$0xff]  }
  0x5e   :  { %2494 = vmatpush3.bf16.msra.mxu0 %v2836_v46  ;;  %v2892_v46 = vld [vmem:[#allocation5 + $0x238] sm:$0xff]  }
  0x5f   :  { %2516 = vmatpush3.bf16.msra.mxu1 %v2837_v47  ;;  %2495 = vmatprep.subr.bf16.mxu0 %v2838_v48  ;;  %v2893_v47 = vld [vmem:[#allocation5 + $0x2b8] sm:$0xff]   ;;  %v70_v48 = vld [vmem:[#allocation2 + $0x48] sm:$0xff] }
  0x60   :  { %2517 = vmatprep.subr.bf16.mxu1 %v2839_v49  ;;  %v94_v49 = vpack.c.bf16 %v70_v48, %v70_v48  ;;  %v2942_v48 = vld [vmem:[#allocation5 + $0x460] sm:$0xff]  }
  0x62   :  { %2496 = vmatpush3.bf16.msra.mxu0 %v2840_v50  ;;  %v72_v50 = vld [vmem:[#allocation2 + $0x58] sm:$0xff] }
  0x63   :  { %2518 = vmatpush3.bf16.msra.mxu1 %v2841_v51  ;;  %2497 = vmatprep.subr.bf16.mxu0 %v2842_v52  ;;  %v69_v51 = vld [vmem:[#allocation2 + $0x40] sm:$0xff]  ;;  %v71_v52 = vld [vmem:[#allocation2 + $0x50] sm:$0xff] }
  0x64   :  { %2519 = vmatprep.subr.bf16.mxu1 %v2843_v53  ;;  %v96_v53 = vpack.c.bf16 %v72_v50, %v72_v50  ;;  %v2944_v50 = vld [vmem:[#allocation5 + $0x420] sm:$0xff]  }
  0x66   :  { %2498 = vmatpush3.bf16.msra.mxu0 %v2844_v54  ;;  %v93_v54 = vpack.c.bf16 %v69_v51, %v69_v51  ;;  %v2945_v51 = vld [vmem:[#allocation5 + $0x4a0] sm:$0xff]  }
  0x67   :  { %2520 = vmatpush3.bf16.msra.mxu1 %v2845_v55  ;;  %2499 = vmatprep.subr.bf16.mxu0 %v2846_v56  ;;  %v95_v55 = vpack.c.bf16 %v71_v52, %v71_v52  ;;  %v2894_v56 = vld [vmem:[#allocation5 + $0x340] sm:$0xff]   ;;  %v2946_v52 = vld [vmem:[#allocation5 + $0x468] sm:$0xff]  }
  0x68   :  { %2521 = vmatprep.subr.bf16.mxu1 %v2847_v57  ;;  %v2895_v57 = vld [vmem:[#allocation5 + $0x3c0] sm:$0xff]  }
  0x6a   :  { %2500 = vmatpush3.bf16.msra.mxu0 %v2848_v58  ;;  %v2896_v58 = vld [vmem:[#allocation5 + $0x300] sm:$0xff]  }
  0x6b   :  { %2522 = vmatpush3.bf16.msra.mxu1 %v2849_v59  ;;  %2501 = vmatprep.subr.bf16.mxu0 %v2850_v60  ;;  %v2897_v59 = vld [vmem:[#allocation5 + $0x380] sm:$0xff]   ;;  %v2898_v60 = vld [vmem:[#allocation5 + $0x348] sm:$0xff]  }
  0x6c   :  { %2523 = vmatprep.subr.bf16.mxu1 %v2851_v61  ;;  %v2899_v61 = vld [vmem:[#allocation5 + $0x3c8] sm:$0xff]  }
  0x6e   :  { %2502 = vmatpush3.bf16.msra.mxu0 %v2852_v62  ;;  %v2900_v62 = vld [vmem:[#allocation5 + $0x308] sm:$0xff]  }
  0x6f   :  { %2524 = vmatpush3.bf16.msra.mxu1 %v2853_v63  ;;  %2503 = vmatprep.subr.bf16.mxu0 %v2854_v0  ;;  %v2901_v63 = vld [vmem:[#allocation5 + $0x388] sm:$0xff]   ;;  %v2902_v0 = vld [vmem:[#allocation5 + $0x350] sm:$0xff]  }
  0x70   :  { %2525 = vmatprep.subr.bf16.mxu1 %v2855_v1  ;;  %v2903_v1 = vld [vmem:[#allocation5 + $0x3d0] sm:$0xff]  }
  0x72   :  { %2504 = vmatpush3.bf16.msra.mxu0 %v2856_v2  ;;  %v2904_v2 = vld [vmem:[#allocation5 + $0x310] sm:$0xff]  }
  0x73   :  { %2526 = vmatpush3.bf16.msra.mxu1 %v2857_v3  ;;  %2505 = vmatprep.subr.bf16.mxu0 %v2858_v4  ;;  %v2905_v3 = vld [vmem:[#allocation5 + $0x390] sm:$0xff]   ;;  %v2906_v4 = vld [vmem:[#allocation5 + $0x358] sm:$0xff]  }
  0x74   :  { %2527 = vmatprep.subr.bf16.mxu1 %v2859_v5  ;;  %v2907_v5 = vld [vmem:[#allocation5 + $0x3d8] sm:$0xff]  }
  0x76   :  { %2506 = vmatpush3.bf16.msra.mxu0 %v2860_v6  ;;  %v2908_v6 = vld [vmem:[#allocation5 + $0x318] sm:$0xff]  }
  0x77   :  { %2528 = vmatpush3.bf16.msra.mxu1 %v2861_v7  ;;  %2535 = vmatprep.subr.bf16.mxu0 %v2862_v16  ;;  %v2909_v7 = vld [vmem:[#allocation5 + $0x398] sm:$0xff]   ;;  %v2918_v16 = vld [vmem:[#allocation5 + $0x370] sm:$0xff]  }
  0x78   :  { %2557 = vmatprep.subr.bf16.mxu1 %v2863_v17  ;;  %v2919_v17 = vld [vmem:[#allocation5 + $0x3f0] sm:$0xff]  }
  0x79   :  { %1765 = vmatmul.mubr.bf16.vlgmr.msra.gmra.mrb[4].mxu0 %v89_v14  ;;  %v2916_v14 = vld [vmem:[#allocation5 + $0x328] sm:$0xff]  }
  0x7a   :  { %1805 = vmatmul.mubr.bf16.vlgmr.msra.gmra.mrb[4].mxu1 %v91_v15  ;;  %2536 = vmatpush3.bf16.msra.mxu0 %v2864_v18  ;;  %v2917_v15 = vld [vmem:[#allocation5 + $0x3a8] sm:$0xff]   ;;  %v2920_v18 = vld [vmem:[#allocation5 + $0x330] sm:$0xff]  }
  0x7b   :  { %2558 = vmatpush3.bf16.msra.mxu1 %v2865_v19  ;;  %2537 = vmatprep.subr.bf16.mxu0 %v2866_v20  ;;  %v2921_v19 = vld [vmem:[#allocation5 + $0x3b0] sm:$0xff]   ;;  %v2922_v20 = vld [vmem:[#allocation5 + $0x378] sm:$0xff]  }
  0x7c   :  { %2559 = vmatprep.subr.bf16.mxu1 %v2867_v21  ;;  %1844 = vmatprep.mubr.bf16.mxu0 %v94_v49  ;;  %v2923_v21 = vld [vmem:[#allocation5 + $0x3f8] sm:$0xff]   ;;  %v2943_v49 = vld [vmem:[#allocation5 + $0x4e0] sm:$0xff]  }
  0x7d   :  { %1884 = vmatprep.mubr.bf16.mxu1 %v96_v53  ;;  %v2947_v53 = vld [vmem:[#allocation5 + $0x4e8] sm:$0xff]  }
  0x7e   :  { %2538 = vmatpush3.bf16.msra.mxu0 %v2868_v22  ;;  %v2924_v22 = vld [vmem:[#allocation5 + $0x338] sm:$0xff]  }
  0x7f   :  { %2560 = vmatpush3.bf16.msra.mxu1 %v2869_v23  ;;  %2539 = vmatprep.subr.bf16.mxu0 %v2870_v24  ;;  %v2925_v23 = vld [vmem:[#allocation5 + $0x3b8] sm:$0xff]   ;;  %v74_v24 = vld [vmem:[#allocation2 + $0x68] sm:$0xff] }
  0x80   :  { %2561 = vmatprep.subr.bf16.mxu1 %v2871_v25  ;;  %v76_v25 = vld [vmem:[#allocation2 + $0x78] sm:$0xff] }
  0x82   :  { %2540 = vmatpush3.bf16.msra.mxu0 %v2872_v26  ;;  %v73_v26 = vld [vmem:[#allocation2 + $0x60] sm:$0xff] }
  0x83   :  { %2562 = vmatpush3.bf16.msra.mxu1 %v2873_v27  ;;  %2541 = vmatprep.subr.bf16.mxu0 %v2874_v28  ;;  %v98_v27 = vpack.c.bf16 %v74_v24, %v74_v24  ;;  %v100_v28 = vpack.c.bf16 %v76_v25, %v76_v25  ;;  %v2974_v24 = vld [vmem:[#allocation5 + $0x560] sm:$0xff]  }
  0x84   :  { %2563 = vmatprep.subr.bf16.mxu1 %v2875_v29  ;;  %v97_v29 = vpack.c.bf16 %v73_v26, %v73_v26  ;;  %v2975_v25 = vld [vmem:[#allocation5 + $0x5e0] sm:$0xff]  }
  0x85   :  { %v2976_v26 = vld [vmem:[#allocation5 + $0x520] sm:$0xff]  }
  0x86   :  { %2542 = vmatpush3.bf16.msra.mxu0 %v2876_v30  ;;  %v75_v30 = vld [vmem:[#allocation2 + $0x70] sm:$0xff] }
  0x87   :  { %2564 = vmatpush3.bf16.msra.mxu1 %v2877_v31  ;;  %2543 = vmatprep.subr.bf16.mxu0 %v2878_v32  ;;  %v99_v31 = vpack.c.bf16 %v75_v30, %v75_v30  ;;  %v2926_v32 = vld [vmem:[#allocation5 + $0x440] sm:$0xff]   ;;  %v2980_v30 = vld [vmem:[#allocation5 + $0x528] sm:$0xff]  }
  0x88   :  { %2565 = vmatprep.subr.bf16.mxu1 %v2879_v33  ;;  %v2927_v33 = vld [vmem:[#allocation5 + $0x4c0] sm:$0xff]  }
  0x8a   :  { %2544 = vmatpush3.bf16.msra.mxu0 %v2880_v34  ;;  %v2928_v34 = vld [vmem:[#allocation5 + $0x400] sm:$0xff]  }
  0x8b   :  { %2566 = vmatpush3.bf16.msra.mxu1 %v2881_v35  ;;  %2545 = vmatprep.subr.bf16.mxu0 %v2882_v36  ;;  %v2929_v35 = vld [vmem:[#allocation5 + $0x480] sm:$0xff]   ;;  %v2930_v36 = vld [vmem:[#allocation5 + $0x448] sm:$0xff]  }
  0x8c   :  { %2567 = vmatprep.subr.bf16.mxu1 %v2883_v37  ;;  %v2931_v37 = vld [vmem:[#allocation5 + $0x4c8] sm:$0xff]  }
  0x8e   :  { %2546 = vmatpush3.bf16.msra.mxu0 %v2884_v38  ;;  %v2932_v38 = vld [vmem:[#allocation5 + $0x408] sm:$0xff]  }
  0x8f   :  { %2568 = vmatpush3.bf16.msra.mxu1 %v2885_v39  ;;  %2547 = vmatprep.subr.bf16.mxu0 %v2886_v40  ;;  %v2933_v39 = vld [vmem:[#allocation5 + $0x488] sm:$0xff]   ;;  %v2934_v40 = vld [vmem:[#allocation5 + $0x450] sm:$0xff]  }
  0x90   :  { %2569 = vmatprep.subr.bf16.mxu1 %v2887_v41  ;;  %v2935_v41 = vld [vmem:[#allocation5 + $0x4d0] sm:$0xff]  }
  0x92   :  { %2548 = vmatpush3.bf16.msra.mxu0 %v2888_v42  ;;  %v2936_v42 = vld [vmem:[#allocation5 + $0x410] sm:$0xff]  }
  0x93   :  { %2570 = vmatpush3.bf16.msra.mxu1 %v2889_v43  ;;  %2549 = vmatprep.subr.bf16.mxu0 %v2890_v44  ;;  %v2937_v43 = vld [vmem:[#allocation5 + $0x490] sm:$0xff]   ;;  %v2938_v44 = vld [vmem:[#allocation5 + $0x458] sm:$0xff]  }
  0x94   :  { %2571 = vmatprep.subr.bf16.mxu1 %v2891_v45  ;;  %v2939_v45 = vld [vmem:[#allocation5 + $0x4d8] sm:$0xff]  }
  0x96   :  { %2550 = vmatpush3.bf16.msra.mxu0 %v2892_v46  ;;  %v2940_v46 = vld [vmem:[#allocation5 + $0x418] sm:$0xff]  }
  0x97   :  { %2572 = vmatpush3.bf16.msra.mxu1 %v2893_v47  ;;  %2579 = vmatprep.subr.bf16.mxu0 %v2894_v56  ;;  %v2941_v47 = vld [vmem:[#allocation5 + $0x498] sm:$0xff]   ;;  %v2950_v56 = vld [vmem:[#allocation5 + $0x470] sm:$0xff]  }
  0x98   :  { %2601 = vmatprep.subr.bf16.mxu1 %v2895_v57  ;;  %v2951_v57 = vld [vmem:[#allocation5 + $0x4f0] sm:$0xff]  }
  0x99   :  { %1845 = vmatmul.mubr.bf16.vlgmr.msra.gmra.mrb[8].mxu0 %v93_v54  ;;  %v2948_v54 = vld [vmem:[#allocation5 + $0x428] sm:$0xff]  }
  0x9a   :  { %1885 = vmatmul.mubr.bf16.vlgmr.msra.gmra.mrb[8].mxu1 %v95_v55  ;;  %2580 = vmatpush3.bf16.msra.mxu0 %v2896_v58  ;;  %v2949_v55 = vld [vmem:[#allocation5 + $0x4a8] sm:$0xff]   ;;  %v2952_v58 = vld [vmem:[#allocation5 + $0x430] sm:$0xff]  }
  0x9b   :  { %2602 = vmatpush3.bf16.msra.mxu1 %v2897_v59  ;;  %2581 = vmatprep.subr.bf16.mxu0 %v2898_v60  ;;  %v2953_v59 = vld [vmem:[#allocation5 + $0x4b0] sm:$0xff]   ;;  %v2954_v60 = vld [vmem:[#allocation5 + $0x478] sm:$0xff]  }
  0x9c   :  { %2603 = vmatprep.subr.bf16.mxu1 %v2899_v61  ;;  %1924 = vmatprep.mubr.bf16.mxu0 %v98_v27  ;;  %v2955_v61 = vld [vmem:[#allocation5 + $0x4f8] sm:$0xff]   ;;  %v2977_v27 = vld [vmem:[#allocation5 + $0x5a0] sm:$0xff]  }
  0x9d   :  { %1964 = vmatprep.mubr.bf16.mxu1 %v100_v28  ;;  %v2978_v28 = vld [vmem:[#allocation5 + $0x568] sm:$0xff]  }
  0x9e   :  { %2582 = vmatpush3.bf16.msra.mxu0 %v2900_v62  ;;  %v2956_v62 = vld [vmem:[#allocation5 + $0x438] sm:$0xff]  }
  0x9f   :  { %2604 = vmatpush3.bf16.msra.mxu1 %v2901_v63  ;;  %2583 = vmatprep.subr.bf16.mxu0 %v2902_v0  ;;  %v2957_v63 = vld [vmem:[#allocation5 + $0x4b8] sm:$0xff]   ;;  %v78_v0 = vld [vmem:[#allocation2 + $0x88] sm:$0xff] }
  0xa0   :  { %2605 = vmatprep.subr.bf16.mxu1 %v2903_v1  ;;  %v80_v1 = vld [vmem:[#allocation2 + $0x98] sm:$0xff] }
  0xa2   :  { %2584 = vmatpush3.bf16.msra.mxu0 %v2904_v2  ;;  %v102_v2 = vpack.c.bf16 %v78_v0, %v78_v0  ;;  %v3095_v0 = vmov 0.0|0.0  }
  0xa3   :  { %2606 = vmatpush3.bf16.msra.mxu1 %v2905_v3  ;;  %2585 = vmatprep.subr.bf16.mxu0 %v2906_v4  ;;  %v104_v3 = vpack.c.bf16 %v80_v1, %v80_v1  ;;  %v77_v4 = vld [vmem:[#allocation2 + $0x80] sm:$0xff] }
  0xa4   :  { %2607 = vmatprep.subr.bf16.mxu1 %v2907_v5  ;;  %v79_v5 = vld [vmem:[#allocation2 + $0x90] sm:$0xff] }
  0xa6   :  { %2586 = vmatpush3.bf16.msra.mxu0 %v2908_v6  ;;  %v101_v6 = vpack.c.bf16 %v77_v4, %v77_v4  ;;  %v2137_v4 = vld [vmem:[#allocation7 + $0x20] sm:$0xff] }
  0xa7   :  { %2608 = vmatpush3.bf16.msra.mxu1 %v2909_v7  ;;  %2587 = vmatprep.subr.bf16.mxu0 %v2910_v8  ;;  %v103_v7 = vpack.c.bf16 %v79_v5, %v79_v5  ;;  %v2958_v8 = vld [vmem:[#allocation5 + $0x540] sm:$0xff]   ;;  %v2138_v5 = vld [vmem:[#allocation7 + $0x28] sm:$0xff] }
  0xa8   :  { %2609 = vmatprep.subr.bf16.mxu1 %v2911_v9  ;;  %v2959_v9 = vld [vmem:[#allocation5 + $0x5c0] sm:$0xff]  }
  0xaa   :  { %2588 = vmatpush3.bf16.msra.mxu0 %v2912_v10  ;;  %v2960_v10 = vld [vmem:[#allocation5 + $0x500] sm:$0xff]  }
  0xab   :  { %2610 = vmatpush3.bf16.msra.mxu1 %v2913_v11  ;;  %2589 = vmatprep.subr.bf16.mxu0 %v2914_v12  ;;  %v2961_v11 = vld [vmem:[#allocation5 + $0x580] sm:$0xff]   ;;  %v2962_v12 = vld [vmem:[#allocation5 + $0x548] sm:$0xff]  }
  0xac   :  { %2611 = vmatprep.subr.bf16.mxu1 %v2915_v13  ;;  %v2963_v13 = vld [vmem:[#allocation5 + $0x5c8] sm:$0xff]  }
  0xae   :  { %2590 = vmatpush3.bf16.msra.mxu0 %v2916_v14  ;;  %v2964_v14 = vld [vmem:[#allocation5 + $0x508] sm:$0xff]  }
  0xaf   :  { %2612 = vmatpush3.bf16.msra.mxu1 %v2917_v15  ;;  %2591 = vmatprep.subr.bf16.mxu0 %v2918_v16  ;;  %v2965_v15 = vld [vmem:[#allocation5 + $0x588] sm:$0xff]   ;;  %v2966_v16 = vld [vmem:[#allocation5 + $0x550] sm:$0xff]  }
  0xb0   :  { %2613 = vmatprep.subr.bf16.mxu1 %v2919_v17  ;;  %v2967_v17 = vld [vmem:[#allocation5 + $0x5d0] sm:$0xff]  }
  0xb2   :  { %2592 = vmatpush3.bf16.msra.mxu0 %v2920_v18  ;;  %v2968_v18 = vld [vmem:[#allocation5 + $0x510] sm:$0xff]  }
  0xb3   :  { %2614 = vmatpush3.bf16.msra.mxu1 %v2921_v19  ;;  %2593 = vmatprep.subr.bf16.mxu0 %v2922_v20  ;;  %v2969_v19 = vld [vmem:[#allocation5 + $0x590] sm:$0xff]   ;;  %v2970_v20 = vld [vmem:[#allocation5 + $0x558] sm:$0xff]  }
  0xb4   :  { %2615 = vmatprep.subr.bf16.mxu1 %v2923_v21  ;;  %v2971_v21 = vld [vmem:[#allocation5 + $0x5d8] sm:$0xff]  }
  0xb6   :  { %2594 = vmatpush3.bf16.msra.mxu0 %v2924_v22  ;;  %v2972_v22 = vld [vmem:[#allocation5 + $0x518] sm:$0xff]  }
  0xb7   :  { %2616 = vmatpush3.bf16.msra.mxu1 %v2925_v23  ;;  %2623 = vmatprep.subr.bf16.mxu0 %v2926_v32  ;;  %v2973_v23 = vld [vmem:[#allocation5 + $0x598] sm:$0xff]   ;;  %v2982_v32 = vld [vmem:[#allocation5 + $0x570] sm:$0xff]  }
  0xb8   :  { %2645 = vmatprep.subr.bf16.mxu1 %v2927_v33  ;;  %v2983_v33 = vld [vmem:[#allocation5 + $0x5f0] sm:$0xff]  }
  0xb9   :  { %1925 = vmatmul.mubr.bf16.vlgmr.msra.gmra.mrb[12].mxu0 %v97_v29  ;;  %v2979_v29 = vld [vmem:[#allocation5 + $0x5e8] sm:$0xff]  }
  0xba   :  { %1965 = vmatmul.mubr.bf16.vlgmr.msra.gmra.mrb[12].mxu1 %v99_v31  ;;  %2624 = vmatpush3.bf16.msra.mxu0 %v2928_v34  ;;  %v2981_v31 = vld [vmem:[#allocation5 + $0x5a8] sm:$0xff]   ;;  %v2984_v34 = vld [vmem:[#allocation5 + $0x530] sm:$0xff]  }
  0xbb   :  { %2646 = vmatpush3.bf16.msra.mxu1 %v2929_v35  ;;  %2625 = vmatprep.subr.bf16.mxu0 %v2930_v36  ;;  %v2985_v35 = vld [vmem:[#allocation5 + $0x5b0] sm:$0xff]   ;;  %v2986_v36 = vld [vmem:[#allocation5 + $0x578] sm:$0xff]  }
  0xbc   :  { %2647 = vmatprep.subr.bf16.mxu1 %v2931_v37  ;;  %2004 = vmatprep.mubr.bf16.mxu0 %v102_v2  ;;  %v2987_v37 = vld [vmem:[#allocation5 + $0x5f8] sm:$0xff]  }
  0xbd   :  { %2044 = vmatprep.mubr.bf16.mxu1 %v104_v3  ;;  %v2136_v2 = vld [vmem:[#allocation7 + $0x18] sm:$0xff] }
  0xbe   :  { %2626 = vmatpush3.bf16.msra.mxu0 %v2932_v38  ;;  %v2988_v38 = vld [vmem:[#allocation5 + $0x538] sm:$0xff]  }
  0xbf   :  { %2648 = vmatpush3.bf16.msra.mxu1 %v2933_v39  ;;  %2627 = vmatprep.subr.bf16.mxu0 %v2934_v40  ;;  %v2989_v39 = vld [vmem:[#allocation5 + $0x5b8] sm:$0xff]   ;;  %v82_v40 = vld [vmem:[#allocation2 + $0xa8] sm:$0xff] }
  0xc0   :  { %2649 = vmatprep.subr.bf16.mxu1 %v2935_v41  ;;  %v106_v41 = vpack.c.bf16 %v82_v40, %v82_v40 }
  0xc2   :  { %2628 = vmatpush3.bf16.msra.mxu0 %v2936_v42  ;;  %v84_v42 = vld [vmem:[#allocation2 + $0xb8] sm:$0xff] }
  0xc3   :  { %2650 = vmatpush3.bf16.msra.mxu1 %v2937_v43  ;;  %2629 = vmatprep.subr.bf16.mxu0 %v2938_v44  ;;  %v81_v43 = vld [vmem:[#allocation2 + $0xa0] sm:$0xff]  ;;  %v83_v44 = vld [vmem:[#allocation2 + $0xb0] sm:$0xff] }
  0xc4   :  { %2651 = vmatprep.subr.bf16.mxu1 %v2939_v45  ;;  %v108_v45 = vpack.c.bf16 %v84_v42, %v84_v42 }
  0xc6   :  { %2630 = vmatpush3.bf16.msra.mxu0 %v2940_v46  ;;  %v105_v46 = vpack.c.bf16 %v81_v43, %v81_v43 }
  0xc7   :  { %2652 = vmatpush3.bf16.msra.mxu1 %v2941_v47  ;;  %2631 = vmatprep.subr.bf16.mxu0 %v2942_v48  ;;  %v107_v47 = vpack.c.bf16 %v83_v44, %v83_v44 }
  0xc8   :  { %2653 = vmatprep.subr.bf16.mxu1 %v2943_v49 }
  0xca   :  { %2632 = vmatpush3.bf16.msra.mxu0 %v2944_v50  ;;  %v2253_v50 = vld [vmem:[%s3185_s2] ss:$0 sm:$0xff] }
  0xcb   :  { %2654 = vmatpush3.bf16.msra.mxu1 %v2945_v51  ;;  %2633 = vmatprep.subr.bf16.mxu0 %v2946_v52 }
  0xcc   :  { %2655 = vmatprep.subr.bf16.mxu1 %v2947_v53 }
  0xce   :  { %2634 = vmatpush3.bf16.msra.mxu0 %v2948_v54 }
  0xcf   :  { %2656 = vmatpush3.bf16.msra.mxu1 %v2949_v55  ;;  %2635 = vmatprep.subr.bf16.mxu0 %v2950_v56 }
  0xd0   :  { %2657 = vmatprep.subr.bf16.mxu1 %v2951_v57 }
  0xd2   :  { %2636 = vmatpush3.bf16.msra.mxu0 %v2952_v58 }
  0xd3   :  { %2658 = vmatpush3.bf16.msra.mxu1 %v2953_v59  ;;  %2637 = vmatprep.subr.bf16.mxu0 %v2954_v60 }
  0xd4   :  { %2659 = vmatprep.subr.bf16.mxu1 %v2955_v61  ;;  %v2133_v61 = vld [vmem:[#allocation7] sm:$0xff] }
  0xd6   :  { %2638 = vmatpush3.bf16.msra.mxu0 %v2956_v62  ;;  %v2134_v62 = vld [vmem:[#allocation7 + $0x8] sm:$0xff] }
  0xd7   :  { %2660 = vmatpush3.bf16.msra.mxu1 %v2957_v63  ;;  %2667 = vmatprep.subr.bf16.mxu0 %v2958_v8  ;;  %v2135_v63 = vld [vmem:[#allocation7 + $0x10] sm:$0xff]  ;;  %v2764_v1 = vpack.c.bf16 %v2134_v62, %v2133_v61  ;;  %v2140_v8 = vld [vmem:[#allocation7 + $0x38] sm:$0xff] }
  0xd8   :  { %2689 = vmatprep.subr.bf16.mxu1 %v2959_v9  ;;  %v2767_v3 = vpack.c.bf16 %v2136_v2, %v2135_v63 }
  0xd9   :  { %2005 = vmatmul.mubr.bf16.vlgmr.msra.gmra.mrb[16].mxu0 %v101_v6  ;;  %v2770_v6 = vpack.c.bf16 %v2138_v5, %v2137_v4 }
  0xda   :  { %2045 = vmatmul.mubr.bf16.vlgmr.msra.gmra.mrb[16].mxu1 %v103_v7  ;;  %2668 = vmatpush3.bf16.msra.mxu0 %v2960_v10  ;;  %v2139_v7 = vld [vmem:[#allocation7 + $0x30] sm:$0xff]  ;;  %v2141_v10 = vld [vmem:[#allocation7 + $0x40] sm:$0xff] }
  0xdb   :  { %2690 = vmatpush3.bf16.msra.mxu1 %v2961_v11  ;;  %2669 = vmatprep.subr.bf16.mxu0 %v2962_v12  ;;  %v2773_v9 = vpack.c.bf16 %v2140_v8, %v2139_v7  ;;  %v2142_v11 = vld [vmem:[#allocation7 + $0x48] sm:$0xff] }
  0xdc   :  { %2691 = vmatprep.subr.bf16.mxu1 %v2963_v13  ;;  %2084 = vmatprep.mubr.bf16.mxu0 %v106_v41  ;;  %v2776_v12 = vpack.c.bf16 %v2142_v11, %v2141_v10  ;;  %v2143_v13 = vld [vmem:[#allocation7 + $0x50] sm:$0xff] }
  0xdd   :  { %2124 = vmatprep.mubr.bf16.mxu1 %v108_v45 }
  0xde   :  { %2670 = vmatpush3.bf16.msra.mxu0 %v2964_v14  ;;  %v2144_v14 = vld [vmem:[#allocation7 + $0x58] sm:$0xff] }
  0xdf   :  { %2692 = vmatpush3.bf16.msra.mxu1 %v2965_v15  ;;  %2671 = vmatprep.subr.bf16.mxu0 %v2966_v16  ;;  %v2779_v15 = vpack.c.bf16 %v2144_v14, %v2143_v13 }
  0xe0   :  { %2693 = vmatprep.subr.bf16.mxu1 %v2967_v17 }
  0xe2   :  { %2672 = vmatpush3.bf16.msra.mxu0 %v2968_v18 }
  0xe3   :  { %2694 = vmatpush3.bf16.msra.mxu1 %v2969_v19  ;;  %2673 = vmatprep.subr.bf16.mxu0 %v2970_v20 }
  0xe4   :  { %2695 = vmatprep.subr.bf16.mxu1 %v2971_v21 }
  0xe6   :  { %2674 = vmatpush3.bf16.msra.mxu0 %v2972_v22 }
  0xe7   :  { %2696 = vmatpush3.bf16.msra.mxu1 %v2973_v23  ;;  %2675 = vmatprep.subr.bf16.mxu0 %v2974_v24 }
  0xe8   :  { %2697 = vmatprep.subr.bf16.mxu1 %v2975_v25 }
  0xea   :  { %2676 = vmatpush3.bf16.msra.mxu0 %v2976_v26 }
  0xeb   :  { %2698 = vmatpush3.bf16.msra.mxu1 %v2977_v27  ;;  %2677 = vmatprep.subr.bf16.mxu0 %v2978_v28  ;;  %v2145_v28 = vld [vmem:[#allocation7 + $0x60] sm:$0xff] }
  0xec   :  { %2699 = vmatprep.subr.bf16.mxu1 %v2979_v29  ;;  %v2146_v29 = vld [vmem:[#allocation7 + $0x68] sm:$0xff] }
  0xee   :  { %2678 = vmatpush3.bf16.msra.mxu0 %v2980_v30  ;;  %v2782_v30 = vpack.c.bf16 %v2146_v29, %v2145_v28 }
  0xef   :  { %2700 = vmatpush3.bf16.msra.mxu1 %v2981_v31  ;;  %2679 = vmatprep.subr.bf16.mxu0 %v2982_v32  ;;  %v2147_v31 = vld [vmem:[#allocation7 + $0x70] sm:$0xff]  ;;  %v2148_v32 = vld [vmem:[#allocation7 + $0x78] sm:$0xff] }
  0xf0   :  { %2701 = vmatprep.subr.bf16.mxu1 %v2983_v33  ;;  %v2785_v33 = vpack.c.bf16 %v2148_v32, %v2147_v31 }
  0xf2   :  { %2680 = vmatpush3.bf16.msra.mxu0 %v2984_v34  ;;  %v3097_v34 = vmov 0.0  }
  0xf3   :  { %2702 = vmatpush3.bf16.msra.mxu1 %v2985_v35  ;;  %2681 = vmatprep.subr.bf16.mxu0 %v2986_v36 }
  0xf4   :  { %2703 = vmatprep.subr.bf16.mxu1 %v2987_v37 }
  0xf6   :  { %2682 = vmatpush3.bf16.msra.mxu0 %v2988_v38 }
  0xf7   :  { %2704 = vmatpush3.bf16.msra.mxu1 %v2989_v39  ;;  %2763 = vmatprep.subr.bf16.mxu0 %v3095_v0 }
  0xf9   :  { %2085 = vmatmul.mubr.bf16.vlgmr.msra.gmra.mrb[20].mxu0 %v105_v46 }
  0xfa   :  { %2125 = vmatmul.mubr.bf16.vlgmr.msra.gmra.mrb[20].mxu1 %v107_v47  ;;  %2765 = vmatpush3.bf16.msra.mxu0 %v2764_v1 }
  0xfb   :  { %2766 = vmatprep.subr.bf16.mxu0 %v3095_v0  ;;  %2760 = vmatprep.mubr.msk.f32.mxu0 %vm3096_vm0, %v3097_v34 }
  0xfe   :  { %2768 = vmatpush3.bf16.msra.mxu0 %v2767_v3 }
  0xff   :  { %2769 = vmatprep.subr.bf16.mxu0 %v3095_v0 }
 0x102   :  { %2771 = vmatpush3.bf16.msra.mxu0 %v2770_v6 }
 0x103   :  { %2772 = vmatprep.subr.bf16.mxu0 %v3095_v0 }
 0x106   :  { %2774 = vmatpush3.bf16.msra.mxu0 %v2773_v9 }
 0x107   :  { %2775 = vmatprep.subr.bf16.mxu0 %v3095_v0 }
 0x10a   :  { %2777 = vmatpush3.bf16.msra.mxu0 %v2776_v12 }
 0x10b   :  { %2778 = vmatprep.subr.bf16.mxu0 %v3095_v0 }
 0x10e   :  { %2780 = vmatpush3.bf16.msra.mxu0 %v2779_v15 }
 0x10f   :  { %2781 = vmatprep.subr.bf16.mxu0 %v3095_v0 }
 0x112   :  { %2783 = vmatpush3.bf16.msra.mxu0 %v2782_v30 }
 0x113   :  { %2784 = vmatprep.subr.bf16.mxu0 %v3095_v0 }
 0x116   :  { %2786 = vmatpush3.bf16.msra.mxu0 %v2785_v33 }
 0x12c   :  { %v2463_v48 = vpop.f32.mrb[0].mxu0 }
 0x12d   :  { %v2485_v49 = vpop.f32.mrb[0].mxu1  ;;  %v2464_v51 = vpop.f32.mrb[1].mxu0 }
 0x12e   :  { %v2486_v52 = vpop.f32.mrb[1].mxu1  ;;  %v2465_v53 = vadd.f32 %v2464_v51, %v2463_v48  ;;  %v2466_v55 = vpop.f32.mrb[2].mxu0 }
 0x12f   :  { %v2487_v54 = vadd.f32 %v2486_v52, %v2485_v49  ;;  %v2488_v56 = vpop.f32.mrb[2].mxu1  ;;  %v2467_v57 = vpop.f32.mrb[3].mxu0 }
 0x130   :  { %v2489_v58 = vpop.f32.mrb[3].mxu1  ;;  %v1687_v59 = vadd.f32 %v2465_v53, %v2253_v50 }
 0x132   :  { %v1727_v60 = vadd.f32 %v2487_v54, %v1687_v59 }
 0x14c   :  { %v2507_v16 = vpop.f32.mrb[4].mxu0 }
 0x14d   :  { %v2529_v17 = vpop.f32.mrb[4].mxu1  ;;  %v2508_v18 = vpop.f32.mrb[5].mxu0 }
 0x14e   :  { %v2509_v19 = vadd.f32 %v2508_v18, %v2507_v16  ;;  %v2530_v20 = vpop.f32.mrb[5].mxu1  ;;  %v2510_v21 = vpop.f32.mrb[6].mxu0 }
 0x14f   :  { %v2531_v22 = vadd.f32 %v2530_v20, %v2529_v17  ;;  %v2532_v23 = vpop.f32.mrb[6].mxu1  ;;  %v2511_v24 = vpop.f32.mrb[7].mxu0  ;;  %v2446_v20 = vld [vmem:[%s3187_s4] ss:$0 sm:$0xff]  ;;  %s3060_s4 = scalar_lea.vmem %s2244_s9, 64 }
 0x150   :  { %v1767_v25 = vadd.f32 %v2509_v19, %v1727_v60  ;;  %v2533_v26 = vpop.f32.mrb[7].mxu1  ;;  %p3061_p10 = scmp.ne.s32.totalorder %s2244_s9, %s3060_s4  ;;  %p3066_p12 = scmp.lt.s32.totalorder %s3060_s4, %s3060_s4 }
 0x152   :  { %v1807_v27 = vadd.f32 %v2531_v22, %v1767_v25  ;;  %p3067_p13 = por %p3066_p12, %p3065_p11 }
 0x154   :  { %p3068_p0 = pnand %p3067_p13, %p3061_p10 }
 0x16c   :  { %v2551_v35 = vpop.f32.mrb[8].mxu0 }
 0x16d   :  { %v2573_v36 = vpop.f32.mrb[8].mxu1  ;;  %v2552_v37 = vpop.f32.mrb[9].mxu0 }
 0x16e   :  { %v2553_v38 = vadd.f32 %v2552_v37, %v2551_v35  ;;  %v2574_v39 = vpop.f32.mrb[9].mxu1  ;;  %v2554_v40 = vpop.f32.mrb[10].mxu0 }
 0x16f   :  { %v2575_v41 = vadd.f32 %v2574_v39, %v2573_v36  ;;  %v2576_v42 = vpop.f32.mrb[10].mxu1  ;;  %v2555_v43 = vpop.f32.mrb[11].mxu0 }
 0x170   :  { %v1847_v44 = vadd.f32 %v2553_v38, %v1807_v27  ;;  %v2577_v45 = vpop.f32.mrb[11].mxu1 }
 0x172   :  { %v1887_v46 = vadd.f32 %v2575_v41, %v1847_v44 }
 0x18c   :  { %v2595_v47 = vpop.f32.mrb[12].mxu0 }
 0x18d   :  { %v2617_v48 = vpop.f32.mrb[12].mxu1  ;;  %v2596_v49 = vpop.f32.mrb[13].mxu0 }
 0x18e   :  { %v2618_v50 = vpop.f32.mrb[13].mxu1  ;;  %v2597_v51 = vadd.f32 %v2596_v49, %v2595_v47  ;;  %v2598_v53 = vpop.f32.mrb[14].mxu0 }
 0x18f   :  { %v2619_v52 = vadd.f32 %v2618_v50, %v2617_v48  ;;  %v2620_v54 = vpop.f32.mrb[14].mxu1  ;;  %v2599_v55 = vpop.f32.mrb[15].mxu0 }
 0x190   :  { %v2621_v56 = vpop.f32.mrb[15].mxu1  ;;  %v1927_v57 = vadd.f32 %v2597_v51, %v1887_v46 }
 0x192   :  { %v1967_v58 = vadd.f32 %v2619_v52, %v1927_v57 }
 0x1ac   :  { %v2639_v59 = vpop.f32.mrb[16].mxu0 }
 0x1ad   :  { %v2661_v60 = vpop.f32.mrb[16].mxu1  ;;  %v2640_v61 = vpop.f32.mrb[17].mxu0 }
 0x1ae   :  { %v2641_v62 = vadd.f32 %v2640_v61, %v2639_v59  ;;  %v2662_v63 = vpop.f32.mrb[17].mxu1  ;;  %v2642_v0 = vpop.f32.mrb[18].mxu0 }
 0x1af   :  { %v2663_v1 = vadd.f32 %v2662_v63, %v2661_v60  ;;  %v2664_v2 = vpop.f32.mrb[18].mxu1  ;;  %v2643_v3 = vpop.f32.mrb[19].mxu0 }
 0x1b0   :  { %v2007_v4 = vadd.f32 %v2641_v62, %v1967_v58  ;;  %v2665_v5 = vpop.f32.mrb[19].mxu1 }
 0x1b2   :  { %v2047_v6 = vadd.f32 %v2663_v1, %v2007_v4 }
 0x1cc   :  { %v2683_v7 = vpop.f32.mrb[20].mxu0 }
 0x1cd   :  { %v2705_v8 = vpop.f32.mrb[20].mxu1  ;;  %v2684_v9 = vpop.f32.mrb[21].mxu0 }
 0x1ce   :  { %v2685_v10 = vadd.f32 %v2684_v9, %v2683_v7  ;;  %v2706_v11 = vpop.f32.mrb[21].mxu1  ;;  %v2686_v12 = vpop.f32.mrb[22].mxu0 }
 0x1cf   :  { %v2707_v13 = vadd.f32 %v2706_v11, %v2705_v8  ;;  %v2708_v14 = vpop.f32.mrb[22].mxu1  ;;  %v2687_v15 = vpop.f32.mrb[23].mxu0 }
 0x1d0   :  { %v2087_v16 = vadd.f32 %v2685_v10, %v2047_v6  ;;  %v2709_v17 = vpop.f32.mrb[23].mxu1 }
 0x1d2   :  { %v2127_v18 = vadd.f32 %v2707_v13, %v2087_v16 }
 0x1d4   :  { %v2132_v19 = vmax.f32 %v2127_v18, 0.0 }
 0x1d6   :  { %2761 = vmatmul.mubr.f32.vlgmr.msra.gmra.mrb[24].mxu0 %v2132_v19 }
 0x2a9   :  { %v2222_v21 = vpop.f32.mrb[24].mxu0 }
 0x2aa   :  { %v2223_v22 = vadd.f32 %v2446_v20, %v2222_v21  ;;  %v2762_v23 = vpop.f32.mrb[25].mxu0 }
 0x2ac   :  { %2226 = vmax.xlane.f32.xlu0 %v2223_v22 }
 0x339   :  { %v2227_v24 = vpop.xlane.xlu0 %2226 }
 0x33a   :  { %v2228_v25 = vsub.f32 %v2223_v22, %v2227_v24 }
 0x33c   :  { %v2229_v26 = vmul.f32 1.442695, %v2228_v25 }
 0x33e   :  { %2990 = vpow2.f32 %v2229_v26 }
 0x348   :  { %v2991_v27 = vpop.eup %2990 }
 0x349   :  { %2231 = vadd.xlane.f32.xlu0 %v2991_v27 }
 0x3d6   :  { %v2232_v28 = vpop.xlane.xlu0 %2231 }
 0x3d7   :  { %2992 = vrcp.f32 %v2232_v28 }
 0x3e1   :  { %v2993_v29 = vpop.eup %2992 }
 0x3e2   :  { %v2234_v30 = vmul.f32 %v2993_v29, %v2991_v27 }
 0x3e4   :  { %v2235_v31 = vpack.c.bf16 %v2234_v30, %v2234_v30 }
 0x3e6   :  { %2236 = vst [vmem:[#allocation8] sm:$0xf] %v2235_v31 }
 0x3e7   :  { %3071 = shalt.err (!%p3068_p0)
}
 0x3e8   :  { %s3072_s12 = scalar_lea.hbm %s3188_s5, 64 }
 0x3e9   :  { %p3073_p1 = scmp.ne.s32.totalorder %s3188_s5, %s3072_s12  ;;  %p3076_p2 = scmp.lt.u32.totalorder %s3072_s12, %s3188_s5 }
 0x3eb   :  { %p3078_p3 = pnand %p3076_p2, %p3073_p1 }
 0x3ed   :  { %3081 = shalt.err (!%p3078_p3)
}
 0x3ee   :  { %2246 = dma.vmem_to_hbm [thread:$0]  %s2244_s9, 64, %s3188_s5, [#allocation4]  }
 0x3ef   :  { %3086 = dma.done.wait [#allocation4], 64  }
 0x3f0   :  { %3087 = vsyncadd [#allocation4], 4294967232 }
 0x3f1   :  { %2250 = vsyncpa [#allocation3], 1 }
 0x3f2   :  { %2251 = vsyncpa [#allocation6], 1 }
 0x3f3   :  { %2252 = vsyncpa [#allocation4], 1 }

</bundles_post_ra>
